<compile_context>
chip_gen: v6e
topology: v6e:2x2x1
jax: 0.10.0
libtpu: 0.0.40
codegen_flags: <defaults>
</compile_context>

<pallas_src>
import math

import jax
import jax.numpy as jnp
from jax.experimental import pallas as pl
from jax.experimental.pallas import tpu as pltpu


# ---------------------------------------------------------------------------
# Kernel: one batch tile -> full (tb, dim+1) embedding slab.
# ---------------------------------------------------------------------------
def posemb_kernel(x_ref, w_ref, o_ref):
    # x_ref: (tb, 1) f32
    # w_ref: (2, D) f32, D = 2*half_dim + 1
    #        row 0 = 2*pi*[0, w, w]   (frequency scale per output lane)
    #        row 1 = [0..0, pi/2..]   (phase shift turning sin into cos)
    # o_ref: (tb, D)
    x = x_ref[...]                                        # (tb, 1)
    t = x * w_ref[0:1, :] + w_ref[1:2, :]                 # (tb, D) broadcast
    lane = jax.lax.broadcasted_iota(jnp.int32, t.shape, 1)
    emb = jnp.sin(t)                                      # one EUP pass: sin & cos
    o_ref[...] = jnp.where(lane == 0, x, emb).astype(o_ref.dtype)


def _round_up(a, b):
    return ((a + b - 1) // b) * b


# ---------------------------------------------------------------------------
# Wrapper: matches RandomOrLearnedSinusoidalPosEmb.forward semantics.
# ---------------------------------------------------------------------------
def sinusoidal_pos_emb(x, weights, *, max_block_b=512):
    """x: (B,) float, weights: (half_dim,) float -> (B, 2*half_dim + 1)."""
    B = x.shape[0]
    half_dim = weights.shape[0]
    D = 2 * half_dim + 1

    # Tiny one-time parameter prep, aligned with the output lane layout.
    w32 = weights.astype(jnp.float32)
    scale_row = (2.0 * math.pi) * jnp.concatenate(
        [jnp.zeros((1,), jnp.float32), w32, w32])
    phase_row = jnp.concatenate(
        [jnp.zeros((1 + half_dim,), jnp.float32),
         jnp.full((half_dim,), 0.5 * math.pi, jnp.float32)])
    w_rows = jnp.stack([scale_row, phase_row]).reshape(2, D)

    x_col = x.reshape(B, 1).astype(jnp.float32)

    # Batch tiling: sublane-aligned tile, padded batch, parallel grid axis.
    tb = min(max_block_b, _round_up(B, 8))
    Bp = _round_up(B, tb)
    if Bp != B:
        x_col = jnp.pad(x_col, ((0, Bp - B), (0, 0)))

    out = pl.pallas_call(
        posemb_kernel,
        out_shape=jax.ShapeDtypeStruct((Bp, D), x.dtype),
        grid=(Bp // tb,),
        in_specs=[
            pl.BlockSpec((tb, 1), lambda i: (i, 0)),   # x tile follows grid
            pl.BlockSpec((2, D), lambda i: (0, 0)),    # param rows, resident
        ],
        out_specs=pl.BlockSpec((tb, D), lambda i: (i, 0)),
        compiler_params=pltpu.CompilerParams(
            dimension_semantics=("parallel",)),
    )(x_col, w_rows)

    return out if Bp == B else out[:B]


# ---------------------------------------------------------------------------
# Pure-JAX reference (mirror of the PyTorch forward) for correctness check.
# ---------------------------------------------------------------------------
def sinusoidal_pos_emb_reference(x, weights):
    x_col = x[:, None].astype(jnp.float32)
    freqs = x_col * weights[None, :].astype(jnp.float32) * (2.0 * math.pi)
    fouriered = jnp.concatenate([jnp.sin(freqs), jnp.cos(freqs)], axis=-1)
    return jnp.concatenate([x_col, fouriered], axis=-1)


if __name__ == "__main__":
    # Small shapes consistent with the module: batch=2, dim=16 (half_dim=8).
    B, DIM = 2, 16
    HALF = DIM // 2

    key = jax.random.PRNGKey(0)
    kx, kw = jax.random.split(key)

    x = jax.random.normal(kx, (B,), dtype=jnp.float32)
    weights = jax.random.normal(kw, (HALF,), dtype=jnp.float32)  # torch.randn

    y = sinusoidal_pos_emb(x, weights)
    y = jax.block_until_ready(y)

    y_ref = sinusoidal_pos_emb_reference(x, weights)
    assert y.shape == (B, DIM + 1), y.shape
    assert jnp.allclose(y, y_ref, atol=1e-4, rtol=1e-4), "mismatch vs reference"

    print("KERNEL_OK")
</pallas_src>

<mosaic_0001>
module attributes {stable_mosaic.version = 11 : i64} {
  func.func @posemb_kernel(%arg0: i32, %arg1: memref<8x1xf32, #tpu.memory_space<vmem>>, %arg2: memref<2x17xf32, #tpu.memory_space<vmem>>, %arg3: memref<8x17xf32, #tpu.memory_space<vmem>>) attributes {dimension_semantics = [#tpu.dimension_semantics<parallel>], iteration_bounds = array<i64: 1>, scalar_prefetch = 0 : i64, scratch_operands = 0 : i64, tpu.core_type = #tpu.core_type<tc>, window_params = [{transform_indices = @transform_0, window_bounds = array<i64: 8, 1>}, {pipeline_mode = #tpu.pipeline_mode<synchronous>, transform_indices = @transform_1, window_bounds = array<i64: 2, 17>}, {transform_indices = @transform_2, window_bounds = array<i64: 8, 17>}]} {
    %c0 = arith.constant 0 : index
    %c0_0 = arith.constant 0 : index
    %0 = vector.load %arg1[%c0, %c0_0] : memref<8x1xf32, #tpu.memory_space<vmem>>, vector<8x1xf32>
    %c0_1 = arith.constant 0 : index
    %c0_2 = arith.constant 0 : index
    %1 = vector.load %arg2[%c0_1, %c0_2] : memref<2x17xf32, #tpu.memory_space<vmem>>, vector<1x17xf32>
    %2 = vector.broadcast %0 : vector<8x1xf32> to vector<8x17xf32>
    %3 = vector.broadcast %1 : vector<1x17xf32> to vector<8x17xf32>
    %4 = arith.mulf %2, %3 : vector<8x17xf32>
    %c1 = arith.constant 1 : index
    %c0_3 = arith.constant 0 : index
    %5 = vector.load %arg2[%c1, %c0_3] : memref<2x17xf32, #tpu.memory_space<vmem>>, vector<1x17xf32>
    %6 = vector.broadcast %5 : vector<1x17xf32> to vector<8x17xf32>
    %7 = arith.addf %4, %6 : vector<8x17xf32>
    %8 = tpu.iota {dimensions = array<i32: 1>} : vector<8x17xi32>
    %9 = math.sin %7 : vector<8x17xf32>
    %c0_i32 = arith.constant 0 : i32
    %10 = vector.broadcast %c0_i32 : i32 to vector<8x17xi32>
    %11 = arith.cmpi eq, %8, %10 : vector<8x17xi32>
    %12 = vector.shape_cast %0 : vector<8x1xf32> to vector<8x1xf32>
    %13 = vector.broadcast %12 : vector<8x1xf32> to vector<8x17xf32>
    %14 = arith.select %11, %13, %9 : vector<8x17xi1>, vector<8x17xf32>
    %c0_4 = arith.constant 0 : index
    %c0_5 = arith.constant 0 : index
    %15 = vector.load %arg3[%c0_4, %c0_5] : memref<8x17xf32, #tpu.memory_space<vmem>>, vector<8x17xf32>
    tpu.vector_store %arg3[%c0_4, %c0_5], %14 {strides = array<i32>} : memref<8x17xf32, #tpu.memory_space<vmem>>, vector<8x17xf32>,
    return
  }
  func.func @transform_0(%arg0: i32) -> (i32, i32) {
    %c0_i32 = arith.constant 0 : i32
    %c0_i32_0 = arith.constant 0 : i32
    return %arg0, %c0_i32 : i32, i32
  }
  func.func @transform_1(%arg0: i32) -> (i32, i32) {
    %c0_i32 = arith.constant 0 : i32
    %c0_i32_0 = arith.constant 0 : i32
    %c0_i32_1 = arith.constant 0 : i32
    return %c0_i32, %c0_i32_0 : i32, i32
  }
  func.func @transform_2(%arg0: i32) -> (i32, i32) {
    %c0_i32 = arith.constant 0 : i32
    %c0_i32_0 = arith.constant 0 : i32
    return %arg0, %c0_i32 : i32, i32
  }
}

</mosaic_0001>

<bundles_post_ra>
// kernel: tpu_custom_call.1
= control target key start
LH: loop header
LB: loop body
LE: loop exit
PB: predicated region body
PF: predicated region fallthrough
CT: control target
= control target key end

     0   :  { %v199_v1 = vmov 0   ;;  %s259_s0 = inlined_call_operand.vmem [shape: f32[8,1], index: 0, kind: input, shape index: {}]   ;;  %s260_s1 = inlined_call_operand.vmem [shape: f32[2,17], index: 1, kind: input, shape index: {}]   ;;  %s261_s2 = inlined_call_operand.hbm [shape: f32[8,17], index: 2, kind: output, shape index: {}]  }
   0x1   :  { %v12_v0 = vld [vmem:[%s259_s0] sm:$0xff]  ;;  %172 = vset.pattern.permute.xlu0 %v199_v1 }
   0x2   :  { %16 = vperm.xlu0 %172, %v12_v0  }
   0x3   :  { %7 = vsyncpa [#allocation3], 0  ;;  %v154_v2 = vld [vmem:[%s260_s1] ss:$0 sm:$0xff]  ;;  %v155_v3 = vld [vmem:[%s260_s1 + $0x1] ss:$0 sm:$0xff] }
   0x4   :  { %v200_v17 = vmov 683565275   ;;  %v201_v19 = vmov 2475754826   ;;  %v202_v22 = vmov 2131351028  }
   0x5   :  { %v203_v25 = vmov 2102212464   ;;  %v204_v28 = vmov 920167782   ;;  %v205_v31 = vmov 1326507024  }
   0x6   :  { %s206_s0 = smov [#allocation2]   ;;  %vm138_vm14 = vcmask 138240  }
   0x7   :  { %s146_s1 = sshll.u32 %s206_s0, 4  ;;  %s147_s1 = int_to_ptr.vmem [resolvable:$true] %s146_s1 }
   0x8   :  { %s177_s15 = scalar_lea.vmem %s147_s1, 128  ;;  %p182_p1 = scmp.lt.s32.totalorder %s147_s1, %s147_s1 }
   0x9   :  { %p178_p0 = scmp.ne.s32.totalorder %s147_s1, %s177_s15  ;;  %p183_p2 = scmp.lt.s32.totalorder %s177_s15, %s177_s15 }
   0xb   :  { %p184_p3 = por %p183_p2, %p182_p1 }
   0xd   :  { %p185_p4 = pnand %p184_p3, %p178_p0 }
  0x7d   :  { %v231_v4 = vpop.permute.xlu0 %16 }
  0x7e   :  { %v23_v5 = vmul.f32 %v154_v2, %v231_v4 }
  0x80   :  { %v234_v6 = vadd.f32 %v155_v3, %v23_v5 }
  0x82   :  { %v35_v7 = vand.u32 2139095040, %v234_v6  ;;  %v32_v11 = vand.u32 2147483647, %v234_v6  ;;  %vm34_vm7 = vcmp.lt.s32.totalorder %v234_v6, 0  ;;  %vm124_vm13 = vweird.f32 %v234_v6 }
  0x84   :  { %v36_v8 = vshrl.u32 %v35_v7, 23  ;;  %v39_v14 = vand.u32 8388607, %v32_v11  ;;  %vm33_vm8 = vcmp.le.f32.partialorder %v32_v11, 0.7853982 }
  0x86   :  { %v156_v9 = vadd.s32 4294967169, %v36_v8  ;;  %v40_v33 = vor.u32 8388608, %v39_v14 }
  0x88   :  { %v42_v10 = vadd.s32 1, %v156_v9  ;;  %v80_v47 = vshll.u32 %v40_v33, 8 }
  0x8a   :  { %vm43_vm0 = vcmp.gt.s32.totalorder %v42_v10, 0 }
  0x8b   :  { %v44_v12 = vsel %vm43_vm0, %v42_v10, 0 }
  0x8c   :  { %v46_v13 = vand.u32 31, %v44_v12  ;;  %v45_v16 = vshrl.u32 %v44_v12, 5 }
  0x8e   :  { %v47_v15 = vsub.s32 32, %v46_v13  ;;  %v49_v18 = vshll.u32 %v200_v17, %v46_v13  ;;  %v52_v20 = vshll.u32 %v201_v19, %v46_v13  ;;  %v55_v24 = vshll.u32 %v202_v22, %v46_v13 }
  0x8f   :  { %v58_v27 = vshll.u32 %v203_v25, %v46_v13  ;;  %v61_v30 = vshll.u32 %v204_v28, %v46_v13  ;;  %vm64_vm1 = vcmp.lt.s32.totalorder %v45_v16, 1  ;;  %vm67_vm2 = vcmp.lt.s32.totalorder %v45_v16, 4 }
  0x90   :  { %v50_v21 = vshrl.u32 %v201_v19, %v47_v15  ;;  %v53_v23 = vshrl.u32 %v202_v22, %v47_v15  ;;  %v56_v26 = vshrl.u32 %v203_v25, %v47_v15  ;;  %v59_v29 = vshrl.u32 %v204_v28, %v47_v15 }
  0x91   :  { %v62_v32 = vshrl.u32 %v205_v31, %v47_v15  ;;  %v48_v42 = vshrl.u32 %v200_v17, %v47_v15  ;;  %vm66_vm3 = vcmp.lt.s32.totalorder %v45_v16, 3  ;;  %vm65_vm4 = vcmp.lt.s32.totalorder %v45_v16, 2 }
  0x92   :  { %v51_v34 = vor.u32 %v50_v21, %v49_v18  ;;  %v54_v35 = vor.u32 %v53_v23, %v52_v20  ;;  %v57_v36 = vor.u32 %v56_v26, %v55_v24  ;;  %v60_v37 = vor.u32 %v59_v29, %v58_v27 }
  0x93   :  { %v63_v38 = vor.u32 %v62_v32, %v61_v30  ;;  %v30_v28 = vlaneseq }
  0x94   :  { %v69_v39 = vsel %vm67_vm2, %v57_v36, 2102212464  ;;  %v72_v40 = vsel %vm64_vm1, %v51_v34, %v54_v35  ;;  %v76_v41 = vsel %vm64_vm1, %v54_v35, %v57_v36  ;;  %v73_v43 = vsel %vm67_vm2, %v60_v37, 920167782 }
  0x95   :  { %v77_v44 = vsel %vm67_vm2, %v63_v38, 1326507024  ;;  %v74_v45 = vsel %vm66_vm3, %v57_v36, %v73_v43  ;;  %v68_v48 = vsel %vm64_vm1, %v48_v42, %v51_v34  ;;  %v70_v49 = vsel %vm66_vm3, %v54_v35, %v69_v39 }
  0x96   :  { %v78_v46 = vsel %vm66_vm3, %v60_v37, %v77_v44  ;;  %v75_v50 = vsel %vm65_vm4, %v72_v40, %v74_v45  ;;  %v71_v56 = vsel %vm65_vm4, %v68_v48, %v70_v49  ;;  %v31_v31 = vand.u32 127, %v30_v28 }
  0x97   :  { %v79_v51 = vsel %vm65_vm4, %v76_v41, %v78_v46  ;;  %v243_v54 = vmul.u32.u64.low %v80_v47, %v75_v50  ;;  %v244_v55 = vmul.u32.u64.high %v80_v47, %v75_v50, %v243_v54  ;;  %v87_v58 = vmul.u32 %v80_v47, %v71_v56 }
  0x98   :  { %v240_v52 = vmul.u32.u64.low %v80_v47, %v79_v51  ;;  %v241_v53 = vmul.u32.u64.high %v80_v47, %v79_v51, %v240_v52  ;;  %vm136_vm11 = vcmp.eq.s32.totalorder %v31_v31, 0 }
  0x99   :  { %v90_v57 = vadd.s32 1, %v244_v55 }
  0x9a   :  { %vm89_vm5 = vc.u32 %v241_v53, %v243_v54  ;;  %v88_v8 = vadd.s32 %v243_v54, %v241_v53 }
  0x9b   :  { %v91_v59 = vsel %vm89_vm5, %v90_v57, %v244_v55 }
  0x9c   :  { %v92_v60 = vadd.s32 %v91_v59, %v87_v58 }
  0x9e   :  { %v93_v61 = vadd.s32 536870912, %v92_v60 }
  0xa0   :  { %v94_v62 = vshrl.u32 %v93_v61, 30 }
  0xa2   :  { %v95_v63 = vshll.u32 %v94_v62, 30  ;;  %v118_v22 = vsub.s32 4, %v94_v62 }
  0xa4   :  { %v96_v0 = vsub.s32 %v92_v60, %v95_v63  ;;  %v119_v25 = vsel %vm34_vm7, %v118_v22, %v94_v62 }
  0xa5   :  { %v121_v26 = vsel %vm33_vm8, 0, %v119_v25 }
  0xa6   :  { %v98_v1 = vsub.s32 0, %v96_v0  ;;  %v125_v27 = vadd.s32 3, %v121_v26 }
  0xa8   :  { %v157_v2 = vmin.u32 %v98_v1, %v96_v0  ;;  %v126_v29 = vand.u32 3, %v125_v27 }
  0xaa   :  { %v100_v3 = vclz %v157_v2  ;;  %vm131_vm9 = vcmp.eq.s32.totalorder %v126_v29, 2  ;;  %vm128_vm10 = vcmp.eq.s32.totalorder %v126_v29, 0  ;;  %vm127_vm12 = vcmp.lt.s32.totalorder %v126_v29, 2 }
  0xac   :  { %v158_v5 = vadd.s32 4294967294, %v100_v3 }
  0xae   :  { %vm159_vm6 = vcmp.lt.s32.totalorder %v158_v5, 0 }
  0xaf   :  { %v103_v7 = vsel %vm159_vm6, 0, %v158_v5 }
  0xb0   :  { %v104_v9 = vsub.s32 32, %v103_v7  ;;  %v108_v10 = vsub.s32 4294967266, %v103_v7  ;;  %v105_v12 = vshll.u32 %v96_v0, %v103_v7 }
  0xb2   :  { %v106_v13 = vshrl.u32 %v88_v8, %v104_v9  ;;  %v109_v14 = vadd.s32 127, %v108_v10 }
  0xb4   :  { %v107_v15 = vor.u32 %v106_v13, %v105_v12  ;;  %v110_v16 = vshll.u32 %v109_v14, 23 }
  0xb6   :  { %v111_v17 = vor.u32 4788187, %v110_v16  ;;  %v114_v19 = vcvt.s32.f32 %v107_v15 }
  0xb8   :  { %v112_v18 = vand.u32 2147483647, %v111_v17 }
  0xba   :  { %v115_v20 = vmul.f32 %v114_v19, %v112_v18 }
  0xbc   :  { %v116_v21 = vxor.u32 2147483648, %v115_v20 }
  0xbe   :  { %v117_v23 = vsel %vm34_vm7, %v116_v21, %v115_v20 }
  0xbf   :  { %v120_v24 = vsel %vm33_vm8, %v234_v6, %v117_v23 }
  0xc0   :  { %173 = vcosq.f32 %v120_v24 }
  0xc1   :  { %175 = vsinq.f32 %v120_v24 }
  0xcd   :  { %v174_v30 = vpop.eup %173 }
  0xce   :  { %v176_v32 = vpop.eup %175  ;;  %v132_v33 = vxor.u32 2147483648, %v174_v30 }
  0xcf   :  { %v129_v34 = vxor.u32 2147483648, %v176_v32 }
  0xd0   :  { %v133_v35 = vsel %vm131_vm9, %v132_v33, %v176_v32 }
  0xd1   :  { %v130_v11 = vsel %vm128_vm10, %v174_v30, %v129_v34 }
  0xd2   :  { %v134_v36 = vsel %vm127_vm12, %v130_v11, %v133_v35 }
  0xd3   :  { %v135_v37 = vsel %vm124_vm13, nan, %v134_v36 }
  0xd4   :  { %v137_v38 = vsel %vm136_vm11, %v231_v4, %v135_v37 }
  0xd5   :  { %139 = vst.msk [vmem:[#allocation2] sm:$0xff] %vm138_vm14, %v137_v38 }
  0xd6   :  { %188 = shalt.err (!%p185_p4)
}
  0xd7   :  { %149 = dma.vmem_to_hbm [thread:$0]  %s147_s1, 128, %s261_s2, [#allocation3]  }
  0xd8   :  { %197 = dma.done.wait [#allocation3], 128  }
  0xd9   :  { %198 = vsyncadd [#allocation3], 4294967168 }
  0xda   :  { %153 = vsyncpa [#allocation3], 1 }

</bundles_post_ra>
